<compile_context>
chip_gen: v6e
topology: v6e:2x2x1
jax: 0.10.0
libtpu: 0.0.40
codegen_flags: <defaults>
</compile_context>

<pallas_src>
import numpy as np
import jax
import jax.numpy as jnp
from jax.experimental import pallas as pl
from jax.experimental.pallas import tpu as pltpu

# ------------------------- configuration (synthetic SMPL) -------------------------
N_VERTS   = 512                         # real SMPL: 6890; kept small for the demo
N_JOINTS  = 24
N_SHAPE   = 10
N_POSEDIR = 9 * (N_JOINTS - 1)          # 207
K_BLEND   = N_SHAPE + N_POSEDIR + 1     # 218 = [betas | lrotmin | 1(template)]
K_PAD     = 224                         # pad reduction dim (multiple of 16 for bf16 sublanes)
TILE_N    = 256                         # lane tile over vertices (multiple of 128)
EPS       = 1e-8
# TODO(synk): torch's rodrigues adds *random* 1e-8 noise before the norm; replaced by a
#             deterministic constant epsilon (semantically equivalent up to ~1e-8).

# Standard SMPL kinematic tree (parents). kintree_table[0]=parents, [1]=joint ids.
_SMPL_PARENTS = np.array(
    [0, 0, 0, 0, 1, 2, 3, 4, 5, 6, 7, 8, 9, 9, 9, 12, 13, 14, 16, 17, 18, 19, 20, 21],
    dtype=np.int64)


# =============================== fused Pallas kernel ===============================
def smpl_fused_kernel(coeff_ref, basis_ref, w_ref, g_ref, st_ref, o_ref):
    """Fused blend-shapes + linear blend skinning for one lane-tile of vertices.

    coeff_ref : [1, K_PAD]          bf16  [betas | lrotmin | 1 | pad]
    basis_ref : [3, K_PAD, TILE_N]  bf16  basis[c, k, n] blend basis for coordinate c
    w_ref     : [24, TILE_N]        f32   skinning weights, vertices on the LANE axis
    g_ref     : [4, 3, 24]          f32   g[b, a, k] = rel_transform[k, a, b]
    st_ref    : [4]                 f32   SMEM scalars: (scale, tx, ty, tz)
    o_ref     : [3, TILE_N]         f32   skinned vertices: xyz on sublanes, verts on lanes

    v[a, n] = scale * sum_{b,k} w[k,n] * rel[k,a,b] * h[b,n] + trans[a],
    with h[b,n] = v_posed[n,b] for b<3 and h[3,n] = 1, where
    v_posed[n,c] = sum_k coeff[k] * basis[c,k,n].
    """
    w = w_ref[...]                                                       # [24, TN] f32
    coeff = coeff_ref[...]                                               # [1, K_PAD] bf16

    # b = 3 term: homogeneous coordinate == 1, no per-vertex scaling needed.
    acc = jnp.dot(g_ref[3], w, preferred_element_type=jnp.float32)       # [3, TN]

    for c in range(3):
        # v_posed coordinate c for every vertex of this tile (bf16 MXU, f32 accumulate).
        h_c = jnp.dot(coeff, basis_ref[c], preferred_element_type=jnp.float32)   # [1, TN]
        acc = acc + jnp.dot(g_ref[c], w, preferred_element_type=jnp.float32) * h_c

    s = st_ref[0]
    o_ref[0:1, :] = acc[0:1, :] * s + st_ref[1]
    o_ref[1:2, :] = acc[1:2, :] * s + st_ref[2]
    o_ref[2:3, :] = acc[2:3, :] * s + st_ref[3]


def smpl_fused_pallas(coeff, basis3, weights_T, gT, st):
    n_pad = basis3.shape[2]
    grid = (pl.cdiv(n_pad, TILE_N),)
    return pl.pallas_call(
        smpl_fused_kernel,
        out_shape=jax.ShapeDtypeStruct((3, n_pad), jnp.float32),
        grid_spec=pltpu.PrefetchScalarGridSpec(
            num_scalar_prefetch=0,
            grid=grid,
            in_specs=[
                pl.BlockSpec((1, K_PAD), lambda i: (0, 0)),                 # coeff (resident)
                pl.BlockSpec((3, K_PAD, TILE_N), lambda i: (0, 0, i)),      # blend basis tile
                pl.BlockSpec((N_JOINTS, TILE_N), lambda i: (0, i)),         # weights tile
                pl.BlockSpec((4, 3, N_JOINTS), lambda i: (0, 0, 0)),        # rel transforms
                pl.BlockSpec(memory_space=pltpu.MemorySpace.SMEM),          # scale + trans
            ],
            out_specs=pl.BlockSpec((3, TILE_N), lambda i: (0, i))),
        compiler_params=pltpu.CompilerParams(
            dimension_semantics=("parallel",)),
    )(coeff, basis3, weights_T, gT, st)


# =============================== JAX glue =========================================
def rodrigues_jax(r):
    """r: [B,1,3] axis-angle -> [B,3,3] rotation matrices (mirrors torch version)."""
    theta = jnp.sqrt(jnp.sum((r + EPS) ** 2, axis=(1, 2), keepdims=True))
    r_hat = r / theta
    cos = jnp.cos(theta)
    z = jnp.zeros((r.shape[0],), r.dtype)
    m = jnp.stack((z, -r_hat[:, 0, 2], r_hat[:, 0, 1],
                   r_hat[:, 0, 2], z, -r_hat[:, 0, 0],
                   -r_hat[:, 0, 1], r_hat[:, 0, 0], z), axis=1).reshape(-1, 3, 3)
    i_cube = jnp.eye(3, dtype=r.dtype)[None]
    dot = jnp.matmul(jnp.transpose(r_hat, (0, 2, 1)), r_hat)
    return cos * i_cube + (1.0 - cos) * dot + jnp.sin(theta) * m


class SMPLModelPallas:
    """Synthetic, deterministically-initialized SMPL model driven by one fused Pallas kernel."""

    def __init__(self, key):
        ks = jax.random.split(key, 6)
        self.v_template = (jax.random.normal(ks[0], (N_VERTS, 3)) * 0.1).astype(jnp.float32)
        self.shapedirs = (jax.random.normal(ks[1], (N_VERTS, 3, N_SHAPE)) * 0.01).astype(jnp.float32)
        self.posedirs = (jax.random.normal(ks[2], (N_VERTS, 3, N_POSEDIR)) * 0.01).astype(jnp.float32)
        jr = jnp.abs(jax.random.normal(ks[3], (N_JOINTS, N_VERTS))) + 1e-3
        self.J_regressor = (jr / jnp.sum(jr, axis=1, keepdims=True)).astype(jnp.float32)
        w = jnp.abs(jax.random.normal(ks[4], (N_VERTS, N_JOINTS))) + 1e-3
        self.weights = (w / jnp.sum(w, axis=1, keepdims=True)).astype(jnp.float32)
        self.kintree_table = np.stack([_SMPL_PARENTS, np.arange(N_JOINTS)], axis=0)
        self.faces = np.stack([np.arange(N_VERTS - 2),
                               np.arange(1, N_VERTS - 1),
                               np.arange(2, N_VERTS)], axis=1).astype(np.int64)  # unused in forward

        # Pad the vertex (lane) axis to a multiple of TILE_N (zero weights -> padded verts
        # just produce `trans`, and are sliced off after the kernel).
        self._n_pad = ((N_VERTS + TILE_N - 1) // TILE_N) * TILE_N
        pad_n = self._n_pad - N_VERTS

        # -- blend basis [3, K_PAD, N_pad]: basis[c, k, n], vertex axis last (lane-dense) --
        basis3 = jnp.concatenate(
            [jnp.transpose(self.shapedirs, (1, 2, 0)),                       # [3, 10,  N]
             jnp.transpose(self.posedirs, (1, 2, 0)),                        # [3, 207, N]
             self.v_template.T[:, None, :],                                  # [3, 1,   N]
             jnp.zeros((3, K_PAD - K_BLEND, N_VERTS), jnp.float32)], axis=1) # pad K -> 224
        basis3 = jnp.pad(basis3, ((0, 0), (0, 0), (0, pad_n)))
        self.basis3 = basis3.astype(jnp.bfloat16)                            # bf16 (bandwidth)

        # -- skinning weights transposed: vertices on the lane axis --
        self.weights_T = jnp.pad(self.weights.T, ((0, 0), (0, pad_n)))       # [24, N_pad] f32

        # -- joint regression hoisted through the (linear) blend:
        #    J = J_regressor @ (shapedirs·betas + v_template) = J_dirs·betas + J_template --
        self.J_dirs = jnp.einsum('jn,nck->jck', self.J_regressor, self.shapedirs)   # [24,3,10]
        self.J_template = jnp.matmul(self.J_regressor, self.v_template)             # [24,3]

        # -- static kinematic-tree structure: parents and depth-levels --
        kt = self.kintree_table
        id_to_col = {kt[1, i]: i for i in range(kt.shape[1])}
        par = np.zeros(N_JOINTS, dtype=np.int32)
        for i in range(1, N_JOINTS):
            par[i] = id_to_col[kt[0, i]]
        depth = np.zeros(N_JOINTS, dtype=np.int32)
        for i in range(1, N_JOINTS):
            depth[i] = depth[par[i]] + 1
        levels = []
        for d in range(1, int(depth.max()) + 1):
            idx = np.nonzero(depth == d)[0].astype(np.int32)
            levels.append((idx, par[idx]))
        self._parents = par
        self._levels = levels

        self._jit_forward = jax.jit(self._forward_impl)

    # ------------------------------------------------------------------ forward
    def _forward_impl(self, betas, pose, scale, trans):
        betas = betas.astype(jnp.float32)
        pose = pose.astype(jnp.float32)
        trans = trans.astype(jnp.float32)
        scale = jnp.asarray(scale, jnp.float32)

        # --- rotations & pose-blend coefficients (tiny; plain JAX) ---
        R = rodrigues_jax(pose.reshape(-1, 1, 3))                                 # [24,3,3]
        lrotmin = (R[1:] - jnp.eye(3, dtype=jnp.float32)[None]).reshape(-1)       # [207]

        # single blend-coefficient row [1, K_PAD] = [betas | lrotmin | 1 | pad]
        coeff = jnp.concatenate([betas, lrotmin, jnp.ones((1,), jnp.float32),
                                 jnp.zeros((K_PAD - K_BLEND,), jnp.float32)])
        coeff = coeff[None, :].astype(jnp.bfloat16)                               # [1, K_PAD]

        # --- joints (exact algebraic refactor of J_regressor @ v_shaped; off the
        #     blend kernel's critical path) ---
        J = jnp.tensordot(self.J_dirs, betas, axes=([2], [0])) + self.J_template  # [24,3]

        # --- kinematic chain, level-parallel (8 batched 4x4 matmuls instead of 23 serial) ---
        t = jnp.concatenate([J[0:1], J[1:] - J[self._parents[1:]]], axis=0)       # [24,3]
        top = jnp.concatenate([R, t[:, :, None]], axis=2)                         # [24,3,4]
        bottom = jnp.broadcast_to(jnp.array([[[0.0, 0.0, 0.0, 1.0]]], dtype=jnp.float32),
                                  (N_JOINTS, 1, 4))
        A = jnp.concatenate([top, bottom], axis=1)                                # [24,4,4]
        G = A
        for joints, parents in self._levels:
            G = G.at[joints].set(jnp.einsum('nij,njk->nik', G[parents], A[joints]))
        Jh = jnp.concatenate([J, jnp.zeros((N_JOINTS, 1), jnp.float32)], axis=1)[:, :, None]
        rel = G - jnp.concatenate([jnp.zeros((N_JOINTS, 4, 3), jnp.float32),
                                   jnp.einsum('nij,njk->nik', G, Jh)], axis=2)    # [24,4,4]

        # --- fused Pallas kernel: blend shapes + LBS + scale + trans ---
        gT = jnp.transpose(rel, (2, 1, 0))[:, :3, :]                              # g[b,a,k]=rel[k,a,b]
        st = jnp.concatenate([jnp.reshape(scale, (1,)), trans])                   # [4] (scale, t)
        vT = smpl_fused_pallas(coeff, self.basis3, self.weights_T, gT, st)        # [3, N_pad]
        return vT[:, :N_VERTS].T                                                  # [N, 3]

    def forward(self, betas, pose, scale, trans):
        return self._jit_forward(betas, pose, scale, trans)


# =============================== numpy reference ===================================
def _rodrigues_np(r):
    theta = np.sqrt(np.sum((r + EPS) ** 2, axis=(1, 2), keepdims=True))
    r_hat = r / theta
    cos = np.cos(theta)
    z = np.zeros((r.shape[0],), r.dtype)
    m = np.stack((z, -r_hat[:, 0, 2], r_hat[:, 0, 1],
                  r_hat[:, 0, 2], z, -r_hat[:, 0, 0],
                  -r_hat[:, 0, 1], r_hat[:, 0, 0], z), axis=1).reshape(-1, 3, 3)
    dot = np.matmul(np.transpose(r_hat, (0, 2, 1)), r_hat)
    return cos * np.eye(3)[None] + (1.0 - cos) * dot + np.sin(theta) * m


def reference_forward_np(model, betas, pose, scale, trans):
    f64 = lambda x: np.asarray(x, np.float64)
    shapedirs, posedirs = f64(model.shapedirs), f64(model.posedirs)
    v_template, Jreg, W = f64(model.v_template), f64(model.J_regressor), f64(model.weights)
    betas, pose, trans = f64(betas), f64(pose), f64(trans)
    scale = float(scale)
    kt = model.kintree_table
    parent = {i: int(kt[0, i]) for i in range(1, kt.shape[1])}

    v_shaped = np.tensordot(shapedirs, betas, axes=([2], [0])) + v_template
    J = Jreg @ v_shaped
    R = _rodrigues_np(pose.reshape(-1, 1, 3))
    lrotmin = (R[1:] - np.eye(3)[None]).reshape(-1)
    v_posed = v_shaped + np.tensordot(posedirs, lrotmin, axes=([2], [0]))

    wz = lambda x: np.concatenate([x, np.array([[0.0, 0.0, 0.0, 1.0]])], axis=0)
    results = [wz(np.concatenate([R[0], J[0].reshape(3, 1)], axis=1))]
    for i in range(1, kt.shape[1]):
        p = parent[i]
        results.append(results[p] @ wz(np.concatenate([R[i], (J[i] - J[p]).reshape(3, 1)], axis=1)))
    stacked = np.stack(results)
    Jh = np.concatenate([J, np.zeros((N_JOINTS, 1))], axis=1).reshape(N_JOINTS, 4, 1)
    rel = stacked - np.concatenate([np.zeros((N_JOINTS, 4, 3)), stacked @ Jh], axis=2)
    T = np.tensordot(W, rel, axes=([1], [0]))
    h = np.concatenate([v_posed, np.ones((N_VERTS, 1))], axis=1)
    v = np.matmul(T, h[..., None]).reshape(-1, 4)[:, :3]
    return v * scale + trans.reshape(1, 3)


# =============================== main ==============================================
if __name__ == "__main__":
    k_model, k_b, k_p = jax.random.split(jax.random.PRNGKey(0), 3)
    model = SMPLModelPallas(k_model)

    betas = jax.random.normal(k_b, (N_SHAPE,), jnp.float32) * 0.03
    pose = jax.random.normal(k_p, (N_JOINTS, 3), jnp.float32) * 0.2
    scale = jnp.asarray(1.5, jnp.float32)
    trans = jnp.array([0.1, -0.2, 0.3], jnp.float32)

    verts = model.forward(betas, pose, scale, trans)
    verts = jax.block_until_ready(verts)

    ref = reference_forward_np(model, betas, pose, scale, trans)
    assert verts.shape == (N_VERTS, 3) and verts.dtype == jnp.float32
    assert np.all(np.isfinite(np.asarray(verts)))
    np.testing.assert_allclose(np.asarray(verts, np.float64), ref, rtol=1e-2, atol=1e-2)
    print("KERNEL_OK")
</pallas_src>

<mosaic_0001>
module attributes {stable_mosaic.version = 11 : i64} {
  func.func @smpl_fused_kernel(%arg0: i32, %arg1: memref<1x224xbf16, #tpu.memory_space<vmem>>, %arg2: memref<3x224x256xbf16, #tpu.memory_space<vmem>>, %arg3: memref<24x256xf32, #tpu.memory_space<vmem>>, %arg4: memref<4x3x24xf32, #tpu.memory_space<vmem>>, %arg5: memref<4xf32, #tpu.memory_space<smem>>, %arg6: memref<3x256xf32, #tpu.memory_space<vmem>>) attributes {dimension_semantics = [#tpu.dimension_semantics<parallel>], iteration_bounds = array<i64: 2>, scalar_prefetch = 0 : i64, scratch_operands = 0 : i64, tpu.core_type = #tpu.core_type<tc>, window_params = [{pipeline_mode = #tpu.pipeline_mode<synchronous>, transform_indices = @transform_0, window_bounds = array<i64: 1, 224>}, {transform_indices = @transform_1, window_bounds = array<i64: 3, 224, 256>}, {transform_indices = @transform_2, window_bounds = array<i64: 24, 256>}, {pipeline_mode = #tpu.pipeline_mode<synchronous>, transform_indices = @transform_3, window_bounds = array<i64: 4, 3, 24>}, {transform_indices = @transform_4, window_bounds = array<i64: 4>}, {transform_indices = @transform_5, window_bounds = array<i64: 3, 256>}]} {
    %c0 = arith.constant 0 : index
    %c0_0 = arith.constant 0 : index
    %0 = vector.load %arg3[%c0, %c0_0] : memref<24x256xf32, #tpu.memory_space<vmem>>, vector<24x256xf32>
    %c0_1 = arith.constant 0 : index
    %c0_2 = arith.constant 0 : index
    %1 = vector.load %arg1[%c0_1, %c0_2] : memref<1x224xbf16, #tpu.memory_space<vmem>>, vector<1x224xbf16>
    %c3 = arith.constant 3 : index
    %c0_3 = arith.constant 0 : index
    %c0_4 = arith.constant 0 : index
    %2 = vector.load %arg4[%c3, %c0_3, %c0_4] : memref<4x3x24xf32, #tpu.memory_space<vmem>>, vector<1x3x24xf32>
    %3 = vector.shape_cast %2 : vector<1x3x24xf32> to vector<3x24xf32>
    %cst = arith.constant dense<0.000000e+00> : vector<3x256xf32>
    %4 = tpu.matmul %3, %0, %cst {dimension_numbers = #tpu.dot_dimension_numbers<[1], [0], [0], [1], [0, 0, 1, 1], [], []>} : vector<3x24xf32>, vector<24x256xf32>, vector<3x256xf32> -> vector<3x256xf32>
    %c0_5 = arith.constant 0 : index
    %c0_6 = arith.constant 0 : index
    %c0_7 = arith.constant 0 : index
    %5 = vector.load %arg2[%c0_5, %c0_6, %c0_7] : memref<3x224x256xbf16, #tpu.memory_space<vmem>>, vector<1x224x256xbf16>
    %6 = vector.shape_cast %5 : vector<1x224x256xbf16> to vector<224x256xbf16>
    %cst_8 = arith.constant dense<0.000000e+00> : vector<1x256xf32>
    %7 = tpu.matmul %1, %6, %cst_8 {dimension_numbers = #tpu.dot_dimension_numbers<[1], [0], [0], [1], [0, 0, 1, 1], [], []>} : vector<1x224xbf16>, vector<224x256xbf16>, vector<1x256xf32> -> vector<1x256xf32>
    %c0_9 = arith.constant 0 : index
    %c0_10 = arith.constant 0 : index
    %c0_11 = arith.constant 0 : index
    %8 = vector.load %arg4[%c0_9, %c0_10, %c0_11] : memref<4x3x24xf32, #tpu.memory_space<vmem>>, vector<1x3x24xf32>
    %9 = vector.shape_cast %8 : vector<1x3x24xf32> to vector<3x24xf32>
    %cst_12 = arith.constant dense<0.000000e+00> : vector<3x256xf32>
    %10 = tpu.matmul %9, %0, %cst_12 {dimension_numbers = #tpu.dot_dimension_numbers<[1], [0], [0], [1], [0, 0, 1, 1], [], []>} : vector<3x24xf32>, vector<24x256xf32>, vector<3x256xf32> -> vector<3x256xf32>
    %11 = vector.broadcast %7 : vector<1x256xf32> to vector<3x256xf32>
    %12 = arith.mulf %10, %11 : vector<3x256xf32>
    %13 = arith.addf %4, %12 : vector<3x256xf32>
    %c1 = arith.constant 1 : index
    %c0_13 = arith.constant 0 : index
    %c0_14 = arith.constant 0 : index
    %14 = vector.load %arg2[%c1, %c0_13, %c0_14] : memref<3x224x256xbf16, #tpu.memory_space<vmem>>, vector<1x224x256xbf16>
    %15 = vector.shape_cast %14 : vector<1x224x256xbf16> to vector<224x256xbf16>
    %cst_15 = arith.constant dense<0.000000e+00> : vector<1x256xf32>
    %16 = tpu.matmul %1, %15, %cst_15 {dimension_numbers = #tpu.dot_dimension_numbers<[1], [0], [0], [1], [0, 0, 1, 1], [], []>} : vector<1x224xbf16>, vector<224x256xbf16>, vector<1x256xf32> -> vector<1x256xf32>
    %c1_16 = arith.constant 1 : index
    %c0_17 = arith.constant 0 : index
    %c0_18 = arith.constant 0 : index
    %17 = vector.load %arg4[%c1_16, %c0_17, %c0_18] : memref<4x3x24xf32, #tpu.memory_space<vmem>>, vector<1x3x24xf32>
    %18 = vector.shape_cast %17 : vector<1x3x24xf32> to vector<3x24xf32>
    %cst_19 = arith.constant dense<0.000000e+00> : vector<3x256xf32>
    %19 = tpu.matmul %18, %0, %cst_19 {dimension_numbers = #tpu.dot_dimension_numbers<[1], [0], [0], [1], [0, 0, 1, 1], [], []>} : vector<3x24xf32>, vector<24x256xf32>, vector<3x256xf32> -> vector<3x256xf32>
    %20 = vector.broadcast %16 : vector<1x256xf32> to vector<3x256xf32>
    %21 = arith.mulf %19, %20 : vector<3x256xf32>
    %22 = arith.addf %13, %21 : vector<3x256xf32>
    %c2 = arith.constant 2 : index
    %c0_20 = arith.constant 0 : index
    %c0_21 = arith.constant 0 : index
    %23 = vector.load %arg2[%c2, %c0_20, %c0_21] : memref<3x224x256xbf16, #tpu.memory_space<vmem>>, vector<1x224x256xbf16>
    %24 = vector.shape_cast %23 : vector<1x224x256xbf16> to vector<224x256xbf16>
    %cst_22 = arith.constant dense<0.000000e+00> : vector<1x256xf32>
    %25 = tpu.matmul %1, %24, %cst_22 {dimension_numbers = #tpu.dot_dimension_numbers<[1], [0], [0], [1], [0, 0, 1, 1], [], []>} : vector<1x224xbf16>, vector<224x256xbf16>, vector<1x256xf32> -> vector<1x256xf32>
    %c2_23 = arith.constant 2 : index
    %c0_24 = arith.constant 0 : index
    %c0_25 = arith.constant 0 : index
    %26 = vector.load %arg4[%c2_23, %c0_24, %c0_25] : memref<4x3x24xf32, #tpu.memory_space<vmem>>, vector<1x3x24xf32>
    %27 = vector.shape_cast %26 : vector<1x3x24xf32> to vector<3x24xf32>
    %cst_26 = arith.constant dense<0.000000e+00> : vector<3x256xf32>
    %28 = tpu.matmul %27, %0, %cst_26 {dimension_numbers = #tpu.dot_dimension_numbers<[1], [0], [0], [1], [0, 0, 1, 1], [], []>} : vector<3x24xf32>, vector<24x256xf32>, vector<3x256xf32> -> vector<3x256xf32>
    %29 = vector.broadcast %25 : vector<1x256xf32> to vector<3x256xf32>
    %30 = arith.mulf %28, %29 : vector<3x256xf32>
    %31 = arith.addf %22, %30 : vector<3x256xf32>
    %c0_27 = arith.constant 0 : index
    %32 = memref.load %arg5[%c0_27] : memref<4xf32, #tpu.memory_space<smem>>
    %33 = vector.extract_strided_slice %31 {offsets = [0, 0], sizes = [1, 256], strides = [1, 1]} : vector<3x256xf32> to vector<1x256xf32>
    %34 = vector.broadcast %32 : f32 to vector<1x256xf32>
    %35 = arith.mulf %33, %34 : vector<1x256xf32>
    %c1_28 = arith.constant 1 : index
    %36 = memref.load %arg5[%c1_28] : memref<4xf32, #tpu.memory_space<smem>>
    %37 = vector.broadcast %36 : f32 to vector<1x256xf32>
    %38 = arith.addf %35, %37 : vector<1x256xf32>
    %c0_29 = arith.constant 0 : index
    %c0_30 = arith.constant 0 : index
    %39 = vector.load %arg6[%c0_29, %c0_30] : memref<3x256xf32, #tpu.memory_space<vmem>>, vector<1x256xf32>
    tpu.vector_store %arg6[%c0_29, %c0_30], %38 {strides = array<i32>} : memref<3x256xf32, #tpu.memory_space<vmem>>, vector<1x256xf32>,
    %40 = vector.extract_strided_slice %31 {offsets = [1, 0], sizes = [1, 256], strides = [1, 1]} : vector<3x256xf32> to vector<1x256xf32>
    %41 = vector.broadcast %32 : f32 to vector<1x256xf32>
    %42 = arith.mulf %40, %41 : vector<1x256xf32>
    %c2_31 = arith.constant 2 : index
    %43 = memref.load %arg5[%c2_31] : memref<4xf32, #tpu.memory_space<smem>>
    %44 = vector.broadcast %43 : f32 to vector<1x256xf32>
    %45 = arith.addf %42, %44 : vector<1x256xf32>
    %c1_32 = arith.constant 1 : index
    %c0_33 = arith.constant 0 : index
    %46 = vector.load %arg6[%c1_32, %c0_33] : memref<3x256xf32, #tpu.memory_space<vmem>>, vector<1x256xf32>
    tpu.vector_store %arg6[%c1_32, %c0_33], %45 {strides = array<i32>} : memref<3x256xf32, #tpu.memory_space<vmem>>, vector<1x256xf32>,
    %47 = vector.extract_strided_slice %31 {offsets = [2, 0], sizes = [1, 256], strides = [1, 1]} : vector<3x256xf32> to vector<1x256xf32>
    %48 = vector.broadcast %32 : f32 to vector<1x256xf32>
    %49 = arith.mulf %47, %48 : vector<1x256xf32>
    %c3_34 = arith.constant 3 : index
    %50 = memref.load %arg5[%c3_34] : memref<4xf32, #tpu.memory_space<smem>>
    %51 = vector.broadcast %50 : f32 to vector<1x256xf32>
    %52 = arith.addf %49, %51 : vector<1x256xf32>
    %c2_35 = arith.constant 2 : index
    %c0_36 = arith.constant 0 : index
    %53 = vector.load %arg6[%c2_35, %c0_36] : memref<3x256xf32, #tpu.memory_space<vmem>>, vector<1x256xf32>
    tpu.vector_store %arg6[%c2_35, %c0_36], %52 {strides = array<i32>} : memref<3x256xf32, #tpu.memory_space<vmem>>, vector<1x256xf32>,
    return
  }
  func.func @transform_0(%arg0: i32) -> (i32, i32) {
    %c0_i32 = arith.constant 0 : i32
    %c0_i32_0 = arith.constant 0 : i32
    %c0_i32_1 = arith.constant 0 : i32
    return %c0_i32, %c0_i32_0 : i32, i32
  }
  func.func @transform_1(%arg0: i32) -> (i32, i32, i32) {
    %c0_i32 = arith.constant 0 : i32
    %c0_i32_0 = arith.constant 0 : i32
    %c0_i32_1 = arith.constant 0 : i32
    return %c0_i32, %c0_i32_0, %arg0 : i32, i32, i32
  }
  func.func @transform_2(%arg0: i32) -> (i32, i32) {
    %c0_i32 = arith.constant 0 : i32
    %c0_i32_0 = arith.constant 0 : i32
    return %c0_i32, %arg0 : i32, i32
  }
  func.func @transform_3(%arg0: i32) -> (i32, i32, i32) {
    %c0_i32 = arith.constant 0 : i32
    %c0_i32_0 = arith.constant 0 : i32
    %c0_i32_1 = arith.constant 0 : i32
    %c0_i32_2 = arith.constant 0 : i32
    return %c0_i32, %c0_i32_0, %c0_i32_1 : i32, i32, i32
  }
  func.func @transform_4(%arg0: i32) -> i32 {
    %c0_i32 = arith.constant 0 : i32
    %c0_i32_0 = arith.constant 0 : i32
    return %c0_i32 : i32
  }
  func.func @transform_5(%arg0: i32) -> (i32, i32) {
    %c0_i32 = arith.constant 0 : i32
    %c0_i32_0 = arith.constant 0 : i32
    return %c0_i32, %arg0 : i32, i32
  }
}

</mosaic_0001>

<bundles_post_ra>
// kernel: _forward_impl.1
= control target key start
LH: loop header
LB: loop body
LE: loop exit
PB: predicated region body
PF: predicated region fallthrough
CT: control target
= control target key end

     0   :  { %10 = vsyncpa [#allocation6], 0  ;;  %s2806_s0 = inlined_call_operand.vmem [shape: bf16[1,224], index: 0, kind: input, shape index: {}]   ;;  %s2807_s1 = inlined_call_operand.vmem [shape: bf16[3,224,512], index: 1, kind: input, shape index: {}]   ;;  %s2808_s2 = inlined_call_operand.vmem [shape: f32[24,512], index: 2, kind: input, shape index: {}]   ;;  %s2809_s3 = inlined_call_operand.vmem [shape: f32[4,3,24], index: 3, kind: input, shape index: {}]   ;;  %s2810_s4 = inlined_call_operand.vmem [shape: f32[4], index: 4, kind: input, shape index: {}]   ;;  %s2811_s5 = inlined_call_operand.hbm [shape: f32[3,512], index: 5, kind: output, shape index: {}]  }
   0x1   :  { %11 = vsyncpa [#allocation5], 0 }
   0x2   :  { %13 = vsyncpa [#allocation5 + $0x1], 0  ;;  %s2324_s18 = smov 0   ;;  %s2326_s19 = smov 0  }
   0x3   :  { %s2328_s20 = smov 0   ;;  %s2330_s21 = smov 0  }
   0x4 LB: > { %s2345_s22 = sadd.s32 4294967295, %s2288_s21   ;;  %s1852_s23 = sadd.s32 4294967294, %s2288_s21   ;;  %s2288_s21 = sphi %s2330_s21, %s2822_s21   ;;  %s2284_s20 = sphi %s2328_s20, %s2821_s20   ;;  %s2280_s19 = sphi %s2326_s19, %s2820_s19   ;;  %s2276_s18 = sphi %s2324_s18, %s2819_s18  }
   0x5   : > { %s2349_s24 = sadd.s32 1, %s2288_s21   ;;  %s47_s25 = sadd.s32 1, %s2284_s20 }
   0x6   : > { %s44_s26 = ssub.s32 %s2288_s21, %s2349_s24  ;;  %p54_p0 = scmp.ne.s32.totalorder %s2284_s20, %s2280_s19 }
   0x7   : > { %p45_p1 = scmp.eq.s32.totalorder %s44_s26, 0  ;;  %p55_p2 = scmp.eq.s32.totalorder %s2288_s21, 0 }
   0x8   : > { %p152_p3 = scmp.eq.s32.totalorder %s2345_s22, 1  ;;  %p157_p4 = scmp.ne.s32.totalorder %s2280_s19, %s2276_s18 }
   0x9   : > { %s2361_s27 = scalar_select %p45_p1, %s2284_s20, %s47_s25  }
   0xa   : > { %p2363_p5 = por %p55_p2, %p54_p0  ;;  %p2367_p6 = por %p152_p3, %p54_p0 }
   0xb   : > { %p158_p7 = scmp.eq.s32.totalorder %s1852_s23, 1  ;;  %p1853_p8 = scmp.ge.s32.totalorder %s2288_s21, 1 }
   0xc   : > { %s2814_s29 = scalar_select %p2367_p6, 1, 0 }
   0xd   : > { %p165_p9 = scmp.lt.s32.totalorder %s2288_s21, 3  ;;  %p2373_p10 = por %p158_p7, %p157_p4 }
   0xe   : > { %p2045_p11 = scmp.eq.s32.totalorder %s2345_s22, 0  ;;  %s184_s9 = sshll.u32 %s2810_s4, 4  ;;  %s185_s9 = int_to_ptr.vmem [resolvable:$true] %s184_s9 }
   0xf   : > { %s2815_s30 = scalar_select %p2373_p10, 1, 0 }
  0x10   : > { %p2378_p12 = pnand %p1853_p8, %p165_p9  ;;  %s2209_s10 = scalar_lea.vmem %s185_s9, 16 }
  0x11   : > { %p2210_p1 = scmp.ne.s32.totalorder %s185_s9, %s2209_s10  ;;  %p2217_p7 = scmp.lt.s32.totalorder %s185_s9, %s185_s9 }
  0x12   : > { %p2037_p13 = pneg %p2378_p12  ;;  %p2218_p8 = scmp.lt.s32.totalorder %s2209_s10, %s2209_s10 }
  0x14   : > { %p2038_p0 = pnand %p2045_p11, %p2037_p13  ;;  %p2219_p9 = por %p2218_p8, %p2217_p7 }
  0x16   : > { %p2211_p2 = pneg %p2038_p0 }
  0x18   : > { %p2212_p3 = pnand %p2211_p2, %p2210_p1 }
  0x1a   : > { %p2213_p4 = pneg %p2212_p3 }
  0x1c   : > { %p2220_p10 = pnand %p2219_p9, %p2213_p4 }
  0x1e   : > { %2223 = shalt.err (!%p2220_p10)
}
  0x1f   : > { %s2290_s11 = smov [#allocation4]   ;;  %p1855_p6 = scmp.ge.s32.totalorder %s2288_s21, 2 }
  0x20   : > { %2040 = dma.vmem_to_smem (!%p2038_p0), %s185_s9, 16, %s2290_s11, [#allocation6]  }
  0x21   : > { %191 = sbr.rel (%p1855_p6) target bundleno = 91 (0x5b), region = 28 }
  0x26   : > { %194 = sbr.rel (!%p2363_p5) target bundleno = 84 (0x54), region = 32  ;;  %s196_s12 = sand.u32 (%p2363_p5), 1, %s2284_s20  }
  0x27   : > { %s2024_s13 = sshll.u32 (%p2363_p5), %s2288_s21, 3  ;;  %s2027_s14 = smul.u32 (%p2363_p5), 672, %s196_s12 }
  0x28   : > { %s2399_s17 = scalar_lea.vmem (%p2363_p5), %s2807_s1, %s2024_s13 }
  0x29   : > { %v396_v0 = vld [vmem:[%s2399_s17] sm:$0xff] (%p2363_p5)  ;;  %v398_v1 = vld [vmem:[%s2399_s17 + $0x10] sm:$0xff] (%p2363_p5)  ;;  %s2407_s23 = scalar_lea.vmem (%p2363_p5), [#allocation2], %s2027_s14 }
  0x2a   : > { %v400_v2 = vld [vmem:[%s2399_s17 + $0x20] sm:$0xff] (%p2363_p5)  ;;  %v402_v3 = vld [vmem:[%s2399_s17 + $0x30] sm:$0xff] (%p2363_p5)  ;;  %397 = vst [vmem:[%s2407_s23] sm:$0xff] (%p2363_p5), %v396_v0  ;;  %399 = vst [vmem:[%s2407_s23 + $0x8] sm:$0xff] (%p2363_p5), %v398_v1 }
  0x2b   : > { %v404_v4 = vld [vmem:[%s2399_s17 + $0x40] sm:$0xff]  ;;  %v406_v5 = vld [vmem:[%s2399_s17 + $0x50] sm:$0xff]  ;;  %401 = vst [vmem:[%s2407_s23 + $0x10] sm:$0xff] %v400_v2  ;;  %403 = vst [vmem:[%s2407_s23 + $0x18] sm:$0xff] %v402_v3 }
  0x2c   : > { %405 = vst [vmem:[%s2407_s23 + $0x20] sm:$0xff] %v404_v4  ;;  %407 = vst [vmem:[%s2407_s23 + $0x28] sm:$0xff] %v406_v5  ;;  %v408_v6 = vld [vmem:[%s2399_s17 + $0x60] sm:$0xff]  ;;  %v410_v7 = vld [vmem:[%s2399_s17 + $0x70] sm:$0xff] }
  0x2d   : > { %v412_v8 = vld [vmem:[%s2399_s17 + $0x80] sm:$0xff]  ;;  %409 = vst [vmem:[%s2407_s23 + $0x30] sm:$0xff] %v408_v6  ;;  %411 = vst [vmem:[%s2407_s23 + $0x38] sm:$0xff] %v410_v7  ;;  %v414_v9 = vld [vmem:[%s2399_s17 + $0x90] sm:$0xff] }
  0x2e   : > { %413 = vst [vmem:[%s2407_s23 + $0x40] sm:$0xff] %v412_v8  ;;  %v416_v10 = vld [vmem:[%s2399_s17 + $0xa0] sm:$0xff]  ;;  %v418_v11 = vld [vmem:[%s2399_s17 + $0xb0] sm:$0xff]  ;;  %415 = vst [vmem:[%s2407_s23 + $0x48] sm:$0xff] %v414_v9 }
  0x2f   : > { %417 = vst [vmem:[%s2407_s23 + $0x50] sm:$0xff] %v416_v10  ;;  %419 = vst [vmem:[%s2407_s23 + $0x58] sm:$0xff] %v418_v11  ;;  %v420_v12 = vld [vmem:[%s2399_s17 + $0xc0] sm:$0xff]  ;;  %v422_v13 = vld [vmem:[%s2399_s17 + $0xd0] sm:$0xff] }
  0x30   : > { %v424_v14 = vld [vmem:[%s2399_s17 + $0xe0] sm:$0xff]  ;;  %421 = vst [vmem:[%s2407_s23 + $0x60] sm:$0xff] %v420_v12  ;;  %423 = vst [vmem:[%s2407_s23 + $0x68] sm:$0xff] %v422_v13  ;;  %v426_v15 = vld [vmem:[%s2399_s17 + $0xf0] sm:$0xff] }
  0x31   : > { %425 = vst [vmem:[%s2407_s23 + $0x70] sm:$0xff] %v424_v14  ;;  %v428_v16 = vld [vmem:[%s2399_s17 + $0x100] sm:$0xff]  ;;  %v430_v17 = vld [vmem:[%s2399_s17 + $0x110] sm:$0xff]  ;;  %427 = vst [vmem:[%s2407_s23 + $0x78] sm:$0xff] %v426_v15 }
  0x32   : > { %429 = vst [vmem:[%s2407_s23 + $0x80] sm:$0xff] %v428_v16  ;;  %431 = vst [vmem:[%s2407_s23 + $0x88] sm:$0xff] %v430_v17  ;;  %v432_v18 = vld [vmem:[%s2399_s17 + $0x120] sm:$0xff]  ;;  %v434_v19 = vld [vmem:[%s2399_s17 + $0x130] sm:$0xff] }
  0x33   : > { %v436_v20 = vld [vmem:[%s2399_s17 + $0x140] sm:$0xff]  ;;  %433 = vst [vmem:[%s2407_s23 + $0x90] sm:$0xff] %v432_v18  ;;  %435 = vst [vmem:[%s2407_s23 + $0x98] sm:$0xff] %v434_v19  ;;  %v438_v21 = vld [vmem:[%s2399_s17 + $0x150] sm:$0xff] }
  0x34   : > { %437 = vst [vmem:[%s2407_s23 + $0xa0] sm:$0xff] %v436_v20  ;;  %v440_v22 = vld [vmem:[%s2399_s17 + $0x160] sm:$0xff]  ;;  %v442_v23 = vld [vmem:[%s2399_s17 + $0x170] sm:$0xff]  ;;  %439 = vst [vmem:[%s2407_s23 + $0xa8] sm:$0xff] %v438_v21 }
  0x35   : > { %441 = vst [vmem:[%s2407_s23 + $0xb0] sm:$0xff] %v440_v22  ;;  %443 = vst [vmem:[%s2407_s23 + $0xb8] sm:$0xff] %v442_v23  ;;  %v444_v24 = vld [vmem:[%s2399_s17 + $0x180] sm:$0xff]  ;;  %v446_v25 = vld [vmem:[%s2399_s17 + $0x190] sm:$0xff] }
  0x36   : > { %v448_v26 = vld [vmem:[%s2399_s17 + $0x1a0] sm:$0xff]  ;;  %445 = vst [vmem:[%s2407_s23 + $0xc0] sm:$0xff] %v444_v24  ;;  %447 = vst [vmem:[%s2407_s23 + $0xc8] sm:$0xff] %v446_v25  ;;  %v450_v27 = vld [vmem:[%s2399_s17 + $0x1b0] sm:$0xff] }
  0x37   : > { %449 = vst [vmem:[%s2407_s23 + $0xd0] sm:$0xff] %v448_v26  ;;  %v452_v28 = vld [vmem:[%s2399_s17 + $0x1c0] sm:$0xff]  ;;  %v454_v29 = vld [vmem:[%s2399_s17 + $0x1d0] sm:$0xff]  ;;  %451 = vst [vmem:[%s2407_s23 + $0xd8] sm:$0xff] %v450_v27 }
  0x38   : > { %453 = vst [vmem:[%s2407_s23 + $0xe0] sm:$0xff] %v452_v28  ;;  %455 = vst [vmem:[%s2407_s23 + $0xe8] sm:$0xff] %v454_v29  ;;  %v456_v30 = vld [vmem:[%s2399_s17 + $0x1e0] sm:$0xff]  ;;  %v458_v31 = vld [vmem:[%s2399_s17 + $0x1f0] sm:$0xff] }
  0x39   : > { %v460_v32 = vld [vmem:[%s2399_s17 + $0x200] sm:$0xff]  ;;  %457 = vst [vmem:[%s2407_s23 + $0xf0] sm:$0xff] %v456_v30  ;;  %459 = vst [vmem:[%s2407_s23 + $0xf8] sm:$0xff] %v458_v31  ;;  %v462_v33 = vld [vmem:[%s2399_s17 + $0x210] sm:$0xff] }
  0x3a   : > { %461 = vst [vmem:[%s2407_s23 + $0x100] sm:$0xff] %v460_v32  ;;  %v464_v34 = vld [vmem:[%s2399_s17 + $0x220] sm:$0xff]  ;;  %v466_v35 = vld [vmem:[%s2399_s17 + $0x230] sm:$0xff]  ;;  %463 = vst [vmem:[%s2407_s23 + $0x108] sm:$0xff] %v462_v33 }
  0x3b   : > { %465 = vst [vmem:[%s2407_s23 + $0x110] sm:$0xff] %v464_v34  ;;  %467 = vst [vmem:[%s2407_s23 + $0x118] sm:$0xff] %v466_v35  ;;  %v468_v36 = vld [vmem:[%s2399_s17 + $0x240] sm:$0xff]  ;;  %v470_v37 = vld [vmem:[%s2399_s17 + $0x250] sm:$0xff] }
  0x3c   : > { %v472_v38 = vld [vmem:[%s2399_s17 + $0x260] sm:$0xff]  ;;  %469 = vst [vmem:[%s2407_s23 + $0x120] sm:$0xff] %v468_v36  ;;  %471 = vst [vmem:[%s2407_s23 + $0x128] sm:$0xff] %v470_v37  ;;  %v474_v39 = vld [vmem:[%s2399_s17 + $0x270] sm:$0xff] }
  0x3d   : > { %473 = vst [vmem:[%s2407_s23 + $0x130] sm:$0xff] %v472_v38  ;;  %v476_v40 = vld [vmem:[%s2399_s17 + $0x280] sm:$0xff]  ;;  %v478_v41 = vld [vmem:[%s2399_s17 + $0x290] sm:$0xff]  ;;  %475 = vst [vmem:[%s2407_s23 + $0x138] sm:$0xff] %v474_v39 }
  0x3e   : > { %477 = vst [vmem:[%s2407_s23 + $0x140] sm:$0xff] %v476_v40  ;;  %479 = vst [vmem:[%s2407_s23 + $0x148] sm:$0xff] %v478_v41  ;;  %v480_v42 = vld [vmem:[%s2399_s17 + $0x2a0] sm:$0xff]  ;;  %v482_v43 = vld [vmem:[%s2399_s17 + $0x2b0] sm:$0xff] }
  0x3f   : > { %v484_v44 = vld [vmem:[%s2399_s17 + $0x2c0] sm:$0xff]  ;;  %481 = vst [vmem:[%s2407_s23 + $0x150] sm:$0xff] %v480_v42  ;;  %483 = vst [vmem:[%s2407_s23 + $0x158] sm:$0xff] %v482_v43  ;;  %v486_v45 = vld [vmem:[%s2399_s17 + $0x2d0] sm:$0xff] }
  0x40   : > { %485 = vst [vmem:[%s2407_s23 + $0x160] sm:$0xff] %v484_v44  ;;  %v488_v46 = vld [vmem:[%s2399_s17 + $0x2e0] sm:$0xff]  ;;  %v490_v47 = vld [vmem:[%s2399_s17 + $0x2f0] sm:$0xff]  ;;  %487 = vst [vmem:[%s2407_s23 + $0x168] sm:$0xff] %v486_v45 }
  0x41   : > { %489 = vst [vmem:[%s2407_s23 + $0x170] sm:$0xff] %v488_v46  ;;  %491 = vst [vmem:[%s2407_s23 + $0x178] sm:$0xff] %v490_v47  ;;  %v492_v48 = vld [vmem:[%s2399_s17 + $0x300] sm:$0xff]  ;;  %v494_v49 = vld [vmem:[%s2399_s17 + $0x310] sm:$0xff] }
  0x42   : > { %v496_v50 = vld [vmem:[%s2399_s17 + $0x320] sm:$0xff]  ;;  %493 = vst [vmem:[%s2407_s23 + $0x180] sm:$0xff] %v492_v48  ;;  %495 = vst [vmem:[%s2407_s23 + $0x188] sm:$0xff] %v494_v49  ;;  %v498_v51 = vld [vmem:[%s2399_s17 + $0x330] sm:$0xff] }
  0x43   : > { %497 = vst [vmem:[%s2407_s23 + $0x190] sm:$0xff] %v496_v50  ;;  %v500_v52 = vld [vmem:[%s2399_s17 + $0x340] sm:$0xff]  ;;  %v502_v53 = vld [vmem:[%s2399_s17 + $0x350] sm:$0xff]  ;;  %499 = vst [vmem:[%s2407_s23 + $0x198] sm:$0xff] %v498_v51 }
  0x44   : > { %501 = vst [vmem:[%s2407_s23 + $0x1a0] sm:$0xff] %v500_v52  ;;  %503 = vst [vmem:[%s2407_s23 + $0x1a8] sm:$0xff] %v502_v53  ;;  %v504_v54 = vld [vmem:[%s2399_s17 + $0x360] sm:$0xff]  ;;  %v506_v55 = vld [vmem:[%s2399_s17 + $0x370] sm:$0xff] }
  0x45   : > { %v508_v56 = vld [vmem:[%s2399_s17 + $0x380] sm:$0xff]  ;;  %505 = vst [vmem:[%s2407_s23 + $0x1b0] sm:$0xff] %v504_v54  ;;  %507 = vst [vmem:[%s2407_s23 + $0x1b8] sm:$0xff] %v506_v55  ;;  %v510_v57 = vld [vmem:[%s2399_s17 + $0x390] sm:$0xff] }
  0x46   : > { %509 = vst [vmem:[%s2407_s23 + $0x1c0] sm:$0xff] %v508_v56  ;;  %v512_v58 = vld [vmem:[%s2399_s17 + $0x3a0] sm:$0xff]  ;;  %v514_v59 = vld [vmem:[%s2399_s17 + $0x3b0] sm:$0xff]  ;;  %511 = vst [vmem:[%s2407_s23 + $0x1c8] sm:$0xff] %v510_v57 }
  0x47   : > { %513 = vst [vmem:[%s2407_s23 + $0x1d0] sm:$0xff] %v512_v58  ;;  %515 = vst [vmem:[%s2407_s23 + $0x1d8] sm:$0xff] %v514_v59  ;;  %v516_v60 = vld [vmem:[%s2399_s17 + $0x3c0] sm:$0xff]  ;;  %v518_v61 = vld [vmem:[%s2399_s17 + $0x3d0] sm:$0xff] }
  0x48   : > { %v520_v62 = vld [vmem:[%s2399_s17 + $0x3e0] sm:$0xff]  ;;  %517 = vst [vmem:[%s2407_s23 + $0x1e0] sm:$0xff] %v516_v60  ;;  %519 = vst [vmem:[%s2407_s23 + $0x1e8] sm:$0xff] %v518_v61  ;;  %v522_v63 = vld [vmem:[%s2399_s17 + $0x3f0] sm:$0xff] }
  0x49   : > { %521 = vst [vmem:[%s2407_s23 + $0x1f0] sm:$0xff] %v520_v62  ;;  %v524_v0 = vld [vmem:[%s2399_s17 + $0x400] sm:$0xff]  ;;  %v526_v1 = vld [vmem:[%s2399_s17 + $0x410] sm:$0xff]  ;;  %523 = vst [vmem:[%s2407_s23 + $0x1f8] sm:$0xff] %v522_v63 }
  0x4a   : > { %525 = vst [vmem:[%s2407_s23 + $0x200] sm:$0xff] %v524_v0  ;;  %527 = vst [vmem:[%s2407_s23 + $0x208] sm:$0xff] %v526_v1  ;;  %v528_v2 = vld [vmem:[%s2399_s17 + $0x420] sm:$0xff]  ;;  %v530_v3 = vld [vmem:[%s2399_s17 + $0x430] sm:$0xff] }
  0x4b   : > { %v532_v4 = vld [vmem:[%s2399_s17 + $0x440] sm:$0xff]  ;;  %529 = vst [vmem:[%s2407_s23 + $0x210] sm:$0xff] %v528_v2  ;;  %531 = vst [vmem:[%s2407_s23 + $0x218] sm:$0xff] %v530_v3  ;;  %v534_v5 = vld [vmem:[%s2399_s17 + $0x450] sm:$0xff] }
  0x4c   : > { %533 = vst [vmem:[%s2407_s23 + $0x220] sm:$0xff] %v532_v4  ;;  %v536_v6 = vld [vmem:[%s2399_s17 + $0x460] sm:$0xff]  ;;  %v538_v7 = vld [vmem:[%s2399_s17 + $0x470] sm:$0xff]  ;;  %535 = vst [vmem:[%s2407_s23 + $0x228] sm:$0xff] %v534_v5 }
  0x4d   : > { %537 = vst [vmem:[%s2407_s23 + $0x230] sm:$0xff] %v536_v6  ;;  %539 = vst [vmem:[%s2407_s23 + $0x238] sm:$0xff] %v538_v7  ;;  %v540_v8 = vld [vmem:[%s2399_s17 + $0x480] sm:$0xff]  ;;  %v542_v9 = vld [vmem:[%s2399_s17 + $0x490] sm:$0xff] }
  0x4e   : > { %v544_v10 = vld [vmem:[%s2399_s17 + $0x4a0] sm:$0xff]  ;;  %541 = vst [vmem:[%s2407_s23 + $0x240] sm:$0xff] %v540_v8  ;;  %543 = vst [vmem:[%s2407_s23 + $0x248] sm:$0xff] %v542_v9  ;;  %v546_v11 = vld [vmem:[%s2399_s17 + $0x4b0] sm:$0xff] }
  0x4f   : > { %545 = vst [vmem:[%s2407_s23 + $0x250] sm:$0xff] %v544_v10  ;;  %v548_v12 = vld [vmem:[%s2399_s17 + $0x4c0] sm:$0xff]  ;;  %v550_v13 = vld [vmem:[%s2399_s17 + $0x4d0] sm:$0xff]  ;;  %547 = vst [vmem:[%s2407_s23 + $0x258] sm:$0xff] %v546_v11 }
  0x50   : > { %549 = vst [vmem:[%s2407_s23 + $0x260] sm:$0xff] %v548_v12  ;;  %551 = vst [vmem:[%s2407_s23 + $0x268] sm:$0xff] %v550_v13  ;;  %v552_v14 = vld [vmem:[%s2399_s17 + $0x4e0] sm:$0xff]  ;;  %v554_v15 = vld [vmem:[%s2399_s17 + $0x4f0] sm:$0xff] }
  0x51   : > { %v556_v16 = vld [vmem:[%s2399_s17 + $0x500] sm:$0xff]  ;;  %553 = vst [vmem:[%s2407_s23 + $0x270] sm:$0xff] %v552_v14  ;;  %555 = vst [vmem:[%s2407_s23 + $0x278] sm:$0xff] %v554_v15  ;;  %v558_v17 = vld [vmem:[%s2399_s17 + $0x510] sm:$0xff] }
  0x52   : > { %557 = vst [vmem:[%s2407_s23 + $0x280] sm:$0xff] %v556_v16  ;;  %v560_v18 = vld [vmem:[%s2399_s17 + $0x520] sm:$0xff]  ;;  %v562_v19 = vld [vmem:[%s2399_s17 + $0x530] sm:$0xff]  ;;  %559 = vst [vmem:[%s2407_s23 + $0x288] sm:$0xff] %v558_v17 }
  0x53   : > { %561 = vst [vmem:[%s2407_s23 + $0x290] sm:$0xff] %v560_v18  ;;  %563 = vst [vmem:[%s2407_s23 + $0x298] sm:$0xff] %v562_v19 }
  0x54 PF: > { %569 = sbr.rel (!%p2363_p5) target bundleno = 91 (0x5b), region = 70  ;;  %s571_s25 = sand.u32 (%p2363_p5), 1, %s2284_s20  }
  0x55   : > { %s2025_s26 = sshll.u32 (%p2363_p5), %s2288_s21, 4  ;;  %s2028_s7 = smul.u32 (%p2363_p5), 48, %s571_s25 }
  0x56   : > { %s576_s10 = scalar_lea.vmem (%p2363_p5), %s2808_s2, %s2025_s26 }
  0x57   : > { %v589_v20 = vld [vmem:[%s576_s10] sm:$0xff] (%p2363_p5)  ;;  %v591_v21 = vld [vmem:[%s576_s10 + $0x8] sm:$0xff] (%p2363_p5)  ;;  %s573_s11 = scalar_lea.vmem (%p2363_p5), [#allocation3], %s2028_s7 }
  0x58   : > { %v593_v22 = vld [vmem:[%s576_s10 + $0x20] sm:$0xff] (%p2363_p5)  ;;  %v595_v23 = vld [vmem:[%s576_s10 + $0x28] sm:$0xff] (%p2363_p5)  ;;  %590 = vst [vmem:[%s573_s11] sm:$0xff] (%p2363_p5), %v589_v20  ;;  %592 = vst [vmem:[%s573_s11 + $0x8] sm:$0xff] (%p2363_p5), %v591_v21 }
  0x59   : > { %v597_v24 = vld [vmem:[%s576_s10 + $0x40] sm:$0xff]  ;;  %v599_v25 = vld [vmem:[%s576_s10 + $0x48] sm:$0xff]  ;;  %594 = vst [vmem:[%s573_s11 + $0x10] sm:$0xff] %v593_v22  ;;  %596 = vst [vmem:[%s573_s11 + $0x18] sm:$0xff] %v595_v23 }
  0x5a   : > { %598 = vst [vmem:[%s573_s11 + $0x20] sm:$0xff] %v597_v24  ;;  %600 = vst [vmem:[%s573_s11 + $0x28] sm:$0xff] %v599_v25 }
  0x5b PF: > { %609 = sbr.rel (%p2378_p12) target bundleno = 440 (0x1b8), region = 93  ;;  %s2581_s28 = sand.u32 (!%p2378_p12), 1, %s2280_s19  }
  0x5c   : > { %s2029_s12 = smul.u32 (!%p2378_p12), 672, %s2581_s28 }
  0x5d   : > { %s2030_s13 = smul.u32 (!%p2378_p12), 48, %s2581_s28 }
  0x5e   : > { %s2585_s14 = scalar_lea.vmem (!%p2378_p12), [#allocation2], %s2029_s12 }
  0x5f   : > { %s621_s15 = scalar_lea.vmem (!%p2378_p12), [#allocation3], %s2030_s13 }
  0x60   : > { %2267 = dma.done.wait (%p2045_p11), [#allocation6], 16  }
  0x61   : > { %2269 = vsyncadd (%p2045_p11), [#allocation6], 4294967280 }
  0x62   : > { %629 = sfence }
  0x63   : > { %v2591_v26 = vld [vmem:[%s621_s15 + $0x28] sm:$0xff]  ;;  %v2593_v27 = vld [vmem:[%s621_s15 + $0x20] sm:$0xff]  ;;  %v2597_v29 = vld [vmem:[%s621_s15 + $0x18] sm:$0xff]  ;;  %v2291_v30 = vmov 0.0   ;;  %vm906_vm0 = vcmask 195584   ;;  %v708_v0 = vlaneseq  ;;  %vm860_vm1 = vcmask 785408  }
  0x64   : > { %936 = vmatprep.subr.mxu1 %v2591_v26  ;;  %v2083_v28 = vld [vmem:[%s2585_s14 + $0x74] ss:$8 sps:$4 sm:$0xff]   ;;  %974 = vmatprep.mubr.f32.mxu1 %v2291_v30  ;;  %v2085_v31 = vld [vmem:[%s2585_s14 + $0x70] ss:$8 sps:$4 sm:$0xff]   ;;  %v2086_v35 = vld [vmem:[%s2585_s14 + $0x64] ss:$8 sps:$4 sm:$0xff]  }
  0x65   : > { %937 = vmatpush1.msra.mxu1 %v2593_v27  ;;  %v2602_v32 = vld [vmem:[%s621_s15 + $0x10] sm:$0xff]  ;;  %v2604_v33 = vld [vmem:[%s621_s15 + $0x8] sm:$0xff]  ;;  %864 = vmatprep.subr.bf16.mxu0 %v2083_v28  ;;  %v2607_v34 = vld [vmem:[%s621_s15] sm:$0xff]  ;;  %v2292_v62 = vmov 1966171168   ;;  %v2657_v6 = vshrl.u32 %v708_v0, 7 }
  0x66   : > { %938 = vmatprep.subr.mxu1 %v2597_v29  ;;  %865 = vmatpush1.bf16.msra.mxu0 %v2085_v31  ;;  %v2088_v36 = vld [vmem:[%s2585_s14 + $0x60] ss:$8 sps:$4 sm:$0xff]   ;;  %v2089_v38 = vld [vmem:[%s2585_s14 + $0x54] ss:$8 sps:$4 sm:$0xff]   ;;  %v2091_v39 = vld [vmem:[%s2585_s14 + $0x50] ss:$8 sps:$4 sm:$0xff]   ;;  %v706_v63 = vunpack.c.l.s4 %v2292_v62 }
  0x67   : > { %939 = vmatpush1.msra.mxu1 %v2602_v32  ;;  %v905_v37 = vld [vmem:[%s2809_s3] sm:$0x7]  ;;  %866 = vmatprep.subr.bf16.mxu0 %v2086_v35  ;;  %v2092_v40 = vld [vmem:[%s2585_s14 + $0x150] ss:$8 sps:$4 sm:$0xff]   ;;  %v2094_v41 = vld [vmem:[%s2585_s14 + $0x154] ss:$8 sps:$4 sm:$0xff]  }
  0x68   : > { %940 = vmatprep.subr.mxu1 %v2604_v33  ;;  %v1863_v42 = vld [vmem:[%s2809_s3 + $0xc] sm:$0x7]  ;;  %v2097_v45 = vld [vmem:[%s2585_s14 + $0x40] ss:$8 sps:$4 sm:$0xff]   ;;  %v2101_v46 = vld [vmem:[%s2585_s14 + $0x34] ss:$8 sps:$4 sm:$0xff]   ;;  %v707_v5 = vunpack.c.0.s8 %v706_v63 }
  0x69   : > { %941 = vmatpush1.msra.mxu1 %v2607_v34  ;;  %v2095_v43 = vld [vmem:[%s2585_s14 + $0x44] ss:$8 sps:$4 sm:$0xff]   ;;  %v2098_v47 = vld [vmem:[%s2585_s14 + $0x140] ss:$8 sps:$4 sm:$0xff]   ;;  %v2106_v48 = vld [vmem:[%s2585_s14 + $0x134] ss:$8 sps:$4 sm:$0xff]  }
  0x6a   : > { %1020 = vmatprep.subr.mxu1 %v2591_v26  ;;  %1894 = vmatmul.mubr.msk.f32.vlgmr.msra.gmra.mxu1 %vm906_vm0, %v905_v37  ;;  %v2100_v44 = vld [vmem:[%s2585_s14 + $0x144] ss:$8 sps:$4 sm:$0xff]   ;;  %v2103_v49 = vld [vmem:[%s2585_s14 + $0x30] ss:$8 sps:$4 sm:$0xff]   ;;  %v2109_v53 = vld [vmem:[%s2585_s14 + $0x20] ss:$8 sps:$4 sm:$0xff]   ;;  %v2664_v11 = vsub.s32 %v707_v5, %v2657_v6 }
  0x6b   : > { %867 = vmatpush1.bf16.msra.mxu0 %v2088_v36  ;;  %1021 = vmatpush1.msra.mxu1 %v2593_v27  ;;  %v2107_v50 = vld [vmem:[%s2585_s14 + $0x24] ss:$8 sps:$4 sm:$0xff]   ;;  %v2104_v51 = vld [vmem:[%s2585_s14 + $0x130] ss:$8 sps:$4 sm:$0xff]   ;;  %v2113_v54 = vld [vmem:[%s2585_s14 + $0x14] ss:$8 sps:$4 sm:$0xff]  }
  0x6c   : > { %1022 = vmatprep.subr.mxu1 %v2597_v29  ;;  %868 = vmatprep.subr.bf16.mxu0 %v2089_v38  ;;  %v2112_v52 = vld [vmem:[%s2585_s14 + $0x124] ss:$8 sps:$4 sm:$0xff]   ;;  %v2110_v55 = vld [vmem:[%s2585_s14 + $0x120] ss:$8 sps:$4 sm:$0xff]   ;;  %v2118_v56 = vld [vmem:[%s2585_s14 + $0x114] ss:$8 sps:$4 sm:$0xff]  }
  0x6d   : > { %1023 = vmatpush1.msra.mxu1 %v2602_v32  ;;  %1058 = vmatprep.mubr.f32.mxu1 %v2291_v30  ;;  %v2115_v57 = vld [vmem:[%s2585_s14 + $0x10] ss:$8 sps:$4 sm:$0xff]   ;;  %v2119_v58 = vld [vmem:[%s2585_s14 + $0x4] ss:$8 sps:$4 sm:$0xff]   ;;  %v2121_v61 = vld [vmem:[%s2585_s14] ss:$8 sps:$4 sm:$0xff]  }
  0x6e   : > { %1024 = vmatprep.subr.mxu1 %v2604_v33  ;;  %v2116_v59 = vld [vmem:[%s2585_s14 + $0x110] ss:$8 sps:$4 sm:$0xff]   ;;  %v2124_v60 = vld [vmem:[%s2585_s14 + $0x104] ss:$8 sps:$4 sm:$0xff]   ;;  %v2125_v1 = vld [vmem:[%s2585_s14 + $0xd4] ss:$8 sps:$4 sm:$0xff]  }
  0x6f   : > { %869 = vmatpush1.bf16.msra.mxu0 %v2091_v39  ;;  %1025 = vmatpush1.msra.mxu1 %v2607_v34  ;;  %v2122_v2 = vld [vmem:[%s2585_s14 + $0x100] ss:$8 sps:$4 sm:$0xff]   ;;  %v2130_v3 = vld [vmem:[%s2585_s14 + $0xf4] ss:$8 sps:$4 sm:$0xff]   ;;  %v2127_v4 = vld [vmem:[%s2585_s14 + $0xd0] ss:$8 sps:$4 sm:$0xff]  }
  0x70   : > { %1234 = vmatprep.subr.bf16.mxu1 %v2094_v41  ;;  %1895 = vmatmul.mubr.msk.f32.vlgmr.msra.gmra.mxu1 %vm906_vm0, %v1863_v42  ;;  %v2131_v7 = vld [vmem:[%s2585_s14 + $0xc4] ss:$8 sps:$4 sm:$0xff]   ;;  %v2128_v8 = vld [vmem:[%s2585_s14 + $0xf0] ss:$8 sps:$4 sm:$0xff]   ;;  %v2133_v10 = vld [vmem:[%s2585_s14 + $0xc0] ss:$8 sps:$4 sm:$0xff]  }
  0x71   : > { %1235 = vmatpush1.bf16.msra.mxu1 %v2092_v40  ;;  %870 = vmatprep.subr.bf16.mxu0 %v2095_v43  ;;  %v2136_v9 = vld [vmem:[%s2585_s14 + $0xe4] ss:$8 sps:$4 sm:$0xff]   ;;  %v2137_v12 = vld [vmem:[%s2585_s14 + $0xb4] ss:$8 sps:$4 sm:$0xff]   ;;  %v2134_v14 = vld [vmem:[%s2585_s14 + $0xe0] ss:$8 sps:$4 sm:$0xff]  }
  0x72   : > { %1236 = vmatprep.subr.bf16.mxu1 %v2100_v44  ;;  %v1864_v13 = vld.sshfl [vmem:[%s2806_s0] sm:$0x11 pattern:$0x75316420]  ;;  %v2142_v16 = vld [vmem:[%s2585_s14 + $0x1b4] ss:$8 sps:$4 sm:$0xff]  }
  0x73   : > { %871 = vmatpush1.bf16.msra.mxu0 %v2097_v45  ;;  %v704_v15 = vcombine.high %v1864_v13, %v1864_v13  ;;  %v2139_v17 = vld [vmem:[%s2585_s14 + $0xb0] ss:$8 sps:$4 sm:$0xff]   ;;  %v2143_v19 = vld [vmem:[%s2585_s14 + $0xa4] ss:$8 sps:$4 sm:$0xff]   ;;  %v2145_v22 = vld [vmem:[%s2585_s14 + $0xa0] ss:$8 sps:$4 sm:$0xff]   ;;  %v2691_v40 = vrot.slane %v1864_v13, %v2664_v11 }
  0x74   : > { %872 = vmatprep.subr.bf16.mxu0 %v2101_v46  ;;  %v2140_v20 = vld [vmem:[%s2585_s14 + $0x1b0] ss:$8 sps:$4 sm:$0xff]   ;;  %v2148_v21 = vld [vmem:[%s2585_s14 + $0x1a4] ss:$8 sps:$4 sm:$0xff]   ;;  %v2149_v23 = vld [vmem:[%s2585_s14 + $0x94] ss:$8 sps:$4 sm:$0xff]  }
  0x75   : > { %1237 = vmatpush1.bf16.msra.mxu1 %v2098_v47  ;;  %v718_v18 = vrot.slane %v704_v15, %v2664_v11  ;;  %v2146_v24 = vld [vmem:[%s2585_s14 + $0x1a0] ss:$8 sps:$4 sm:$0xff]   ;;  %v2154_v25 = vld [vmem:[%s2585_s14 + $0x194] ss:$8 sps:$4 sm:$0xff]   ;;  %v2151_v28 = vld [vmem:[%s2585_s14 + $0x90] ss:$8 sps:$4 sm:$0xff]  }
  0x76   : > { %1238 = vmatprep.subr.bf16.mxu1 %v2106_v48  ;;  %v2155_v31 = vld [vmem:[%s2585_s14 + $0x84] ss:$8 sps:$4 sm:$0xff]   ;;  %v2152_v35 = vld [vmem:[%s2585_s14 + $0x190] ss:$8 sps:$4 sm:$0xff]   ;;  %v2157_v37 = vld [vmem:[%s2585_s14 + $0x80] ss:$8 sps:$4 sm:$0xff]  }
  0x77   : > { %873 = vmatpush1.bf16.msra.mxu0 %v2103_v49  ;;  %1893 = vmatprep.mubr.msk.bf16.mxu0 %vm860_vm1, %v718_v18  ;;  %v2160_v36 = vld [vmem:[%s2585_s14 + $0x184] ss:$8 sps:$4 sm:$0xff]   ;;  %v2163_v38 = vld [vmem:[%s2585_s14 + $0x234] ss:$8 sps:$4 sm:$0xff]   ;;  %v2158_v39 = vld [vmem:[%s2585_s14 + $0x180] ss:$8 sps:$4 sm:$0xff]  }
  0x78   : > { %874 = vmatprep.subr.bf16.mxu0 %v2107_v50  ;;  %1952 = vmatprep.mubr.msk.bf16.mxu1 %vm860_vm1, %v718_v18  ;;  %v2166_v41 = vld [vmem:[%s2585_s14 + $0x174] ss:$8 sps:$4 sm:$0xff]   ;;  %v2161_v42 = vld [vmem:[%s2585_s14 + $0x230] ss:$8 sps:$4 sm:$0xff]   ;;  %v2169_v43 = vld [vmem:[%s2585_s14 + $0x224] ss:$8 sps:$4 sm:$0xff]  }
  0x79   : > { %1239 = vmatpush1.bf16.msra.mxu1 %v2104_v51  ;;  %v2164_v44 = vld [vmem:[%s2585_s14 + $0x170] ss:$8 sps:$4 sm:$0xff]   ;;  %v2172_v45 = vld [vmem:[%s2585_s14 + $0x164] ss:$8 sps:$4 sm:$0xff]   ;;  %v2167_v46 = vld [vmem:[%s2585_s14 + $0x220] ss:$8 sps:$4 sm:$0xff]  }
  0x7a   : > { %1240 = vmatprep.subr.bf16.mxu1 %v2112_v52  ;;  %v2175_v47 = vld [vmem:[%s2585_s14 + $0x214] ss:$8 sps:$4 sm:$0xff]   ;;  %v2170_v48 = vld [vmem:[%s2585_s14 + $0x160] ss:$8 sps:$4 sm:$0xff]   ;;  %v2173_v49 = vld [vmem:[%s2585_s14 + $0x210] ss:$8 sps:$4 sm:$0xff]  }
  0x7b   : > { %875 = vmatpush1.bf16.msra.mxu0 %v2109_v53  ;;  %v2178_v50 = vld [vmem:[%s2585_s14 + $0x204] ss:$8 sps:$4 sm:$0xff]   ;;  %v2176_v51 = vld [vmem:[%s2585_s14 + $0x200] ss:$8 sps:$4 sm:$0xff]   ;;  %v2181_v52 = vld [vmem:[%s2585_s14 + $0x1f4] ss:$8 sps:$4 sm:$0xff]  }
  0x7c   : > { %876 = vmatprep.subr.bf16.mxu0 %v2113_v54  ;;  %v2179_v53 = vld [vmem:[%s2585_s14 + $0x1f0] ss:$8 sps:$4 sm:$0xff]   ;;  %v2184_v54 = vld [vmem:[%s2585_s14 + $0x1e4] ss:$8 sps:$4 sm:$0xff]   ;;  %v2200_v62 = vld [vmem:[%s2585_s14 + $0x260] ss:$8 sps:$4 sm:$0xff]  }
  0x7d   : > { %1241 = vmatpush1.bf16.msra.mxu1 %v2110_v55  ;;  %v1953_v55 = vld [vmem:[%s2809_s3 + $0x4] sm:$0x7]  ;;  %v2205_v63 = vld [vmem:[%s2585_s14 + $0x254] ss:$8 sps:$4 sm:$0xff]   ;;  %s2751_s11 = sld [smem:[#allocation4]]  ;;  %s1862_s15 = sshll.u32 %s2581_s28, 3 }
  0x7e   : > { %1242 = vmatprep.subr.bf16.mxu1 %v2118_v56  ;;  %v2182_v56 = vld [vmem:[%s2585_s14 + $0x1e0] ss:$8 sps:$4 sm:$0xff]   ;;  %s2753_s12 = sld [smem:[#allocation4 + $0x1]]  ;;  %vm1689_vm2 = vcmp.lt.s32.totalorder %v708_v0, 256  ;;  %s2026_s6 = sshll.u32 %s2345_s22, 7 }
  0x7f   : > { %877 = vmatpush1.bf16.msra.mxu0 %v2115_v57  ;;  %v2187_v57 = vld [vmem:[%s2585_s14 + $0x1d4] ss:$8 sps:$4 sm:$0xff]   ;;  %s2015_s13 = sld [smem:[#allocation4 + $0x2]]  ;;  %s654_s16 = scalar_lea.vmem [#allocation7], %s1862_s15 }
  0x80   : > { %878 = vmatprep.subr.bf16.mxu0 %v2119_v58  ;;  %v2185_v58 = vld [vmem:[%s2585_s14 + $0x1d0] ss:$8 sps:$4 sm:$0xff]   ;;  %s1757_s17 = sshll.u32 %s654_s16, 4  ;;  %s2769_s26 = scalar_lea.hbm %s2811_s5, %s2026_s6  ;;  %s1758_s17 = int_to_ptr.vmem [resolvable:$true] %s1757_s17 }
  0x81   : > { %1243 = vmatpush1.bf16.msra.mxu1 %v2116_v59  ;;  %v2190_v59 = vld [vmem:[%s2585_s14 + $0x1c4] ss:$8 sps:$4 sm:$0xff]   ;;  %s1743_s22 = scalar_lea.sflag [#allocation5], %s2581_s28  ;;  %s2224_s7 = scalar_lea.vmem %s1758_s17, 128 }
  0x82   : > { %1244 = vmatprep.subr.bf16.mxu1 %v2124_v60  ;;  %v2197_v60 = vld [vmem:[%s2585_s14 + $0x270] ss:$8 sps:$4 sm:$0xff]   ;;  %p2225_p5 = scmp.ne.s32.totalorder %s1758_s17, %s2224_s7  ;;  %p2817_p10 = scmp.ne.s32.totalorder %s2814_s29, 0 }
  0x83   : > { %879 = vmatpush1.bf16.msra.mxu0 %v2121_v61  ;;  %v2202_v61 = vld [vmem:[%s2585_s14 + $0x264] ss:$8 sps:$4 sm:$0xff]   ;;  %s2293_s8 = smov [#allocation7]  }
  0x84   : > { %884 = vmatprep.subr.bf16.mxu0 %v2125_v1  ;;  %v2203_v1 = vld [vmem:[%s2585_s14 + $0x250] ss:$8 sps:$4 sm:$0xff]   ;;  %p2226_p11 = pnand %p2225_p5, %p2817_p10  ;;  %s2228_s9 = sshll.u32 %s2293_s8, 4  ;;  %s2229_s9 = int_to_ptr.vmem [resolvable:$false] %s2228_s9 }
  0x85   : > { %1245 = vmatpush1.bf16.msra.mxu1 %v2122_v2  ;;  %v2208_v2 = vld [vmem:[%s2585_s14 + $0x244] ss:$8 sps:$4 sm:$0xff]   ;;  %s2230_s10 = scalar_lea.vmem %s2229_s9, 256  ;;  %p2231_p13 = scmp.lt.s32.totalorder %s1758_s17, %s2229_s9 }
  0x86   : > { %1246 = vmatprep.subr.bf16.mxu1 %v2130_v3  ;;  %v2206_v3 = vld [vmem:[%s2585_s14 + $0x240] ss:$8 sps:$4 sm:$0xff]   ;;  %p2227_p12 = pneg %p2226_p11  ;;  %p2232_p0 = scmp.lt.s32.totalorder %s2230_s10, %s2224_s7 }
  0x87   : > { %885 = vmatpush2.bf16.msra.mxu0 %v2127_v4 }
  0x88   : > { %886 = vmatprep.subr.bf16.mxu0 %v2131_v7  ;;  %p2233_p1 = por %p2232_p0, %p2231_p13 }
  0x89   : > { %1247 = vmatpush1.bf16.msra.mxu1 %v2128_v8 }
  0x8a   : > { %1248 = vmatprep.subr.bf16.mxu1 %v2136_v9  ;;  %p2234_p2 = pnand %p2233_p1, %p2227_p12 }
  0x8b   : > { %887 = vmatpush2.bf16.msra.mxu0 %v2133_v10 }
  0x8c   : > { %888 = vmatprep.subr.bf16.mxu0 %v2137_v12 }
  0x8d   : > { %1249 = vmatpush1.bf16.msra.mxu1 %v2134_v14 }
  0x8e   : > { %1254 = vmatprep.subr.bf16.mxu1 %v2142_v16 }
  0x8f   : > { %889 = vmatpush2.bf16.msra.mxu0 %v2139_v17 }
  0x90   : > { %890 = vmatprep.subr.bf16.mxu0 %v2143_v19 }
  0x91   : > { %1255 = vmatpush2.bf16.msra.mxu1 %v2140_v20 }
  0x92   : > { %1256 = vmatprep.subr.bf16.mxu1 %v2148_v21 }
  0x93   : > { %891 = vmatpush2.bf16.msra.mxu0 %v2145_v22 }
  0x94   : > { %892 = vmatprep.subr.bf16.mxu0 %v2149_v23 }
  0x95   : > { %1257 = vmatpush2.bf16.msra.mxu1 %v2146_v24 }
  0x96   : > { %1258 = vmatprep.subr.bf16.mxu1 %v2154_v25 }
  0x97   : > { %893 = vmatpush2.bf16.msra.mxu0 %v2151_v28 }
  0x98   : > { %894 = vmatprep.subr.bf16.mxu0 %v2155_v31 }
  0x99   : > { %1259 = vmatpush2.bf16.msra.mxu1 %v2152_v35 }
  0x9a   : > { %1260 = vmatprep.subr.bf16.mxu1 %v2160_v36 }
  0x9b   : > { %895 = vmatpush2.bf16.msra.mxu0 %v2157_v37 }
  0x9c   : > { %1532 = vmatprep.subr.bf16.mxu0 %v2163_v38 }
  0x9d   : > { %1261 = vmatpush2.bf16.msra.mxu1 %v2158_v39 }
  0x9e   : > { %897 = vmatmul.mubr.bf16.vlgmr.msra.gmra.mxu0 %v2691_v40  ;;  %1262 = vmatprep.subr.bf16.mxu1 %v2166_v41 }
  0x9f   : > { %1533 = vmatpush1.bf16.msra.mxu0 %v2161_v42  ;;  %2011 = vmatprep.mubr.msk.bf16.mxu0 %vm860_vm1, %v718_v18  ;;  %v983_v18 = vsub.s32 0, %v2657_v6 }
  0xa0   : > { %1534 = vmatprep.subr.bf16.mxu0 %v2169_v43 }
  0xa1   : > { %1263 = vmatpush2.bf16.msra.mxu1 %v2164_v44  ;;  %v1662_v44 = vstv %s2751_s11 }
  0xa2   : > { %1264 = vmatprep.subr.bf16.mxu1 %v2172_v45 }
  0xa3   : > { %1535 = vmatpush1.bf16.msra.mxu0 %v2167_v46 }
  0xa4   : > { %1536 = vmatprep.subr.bf16.mxu0 %v2175_v47 }
  0xa5   : > { %1265 = vmatpush2.bf16.msra.mxu1 %v2170_v48 }
  0xa6   : > { %1306 = vmatprep.subr.mxu1 %v2591_v26 }
  0xa7   : > { %1537 = vmatpush1.bf16.msra.mxu0 %v2173_v49 }
  0xa8   : > { %1267 = vmatmul.mubr.bf16.vlgmr.msra.gmra.mxu1 %v2691_v40  ;;  %1538 = vmatprep.subr.bf16.mxu0 %v2178_v50 }
  0xa9   : > { %1307 = vmatpush1.msra.mxu1 %v2593_v27  ;;  %1344 = vmatprep.mubr.f32.mxu1 %v2291_v30 }
  0xaa   : > { %1308 = vmatprep.subr.mxu1 %v2597_v29 }
  0xab   : > { %1539 = vmatpush1.bf16.msra.mxu0 %v2176_v51  ;;  %1309 = vmatpush1.msra.mxu1 %v2602_v32 }
  0xac   : > { %1310 = vmatprep.subr.mxu1 %v2604_v33  ;;  %1540 = vmatprep.subr.bf16.mxu0 %v2181_v52  ;;  %v1666_v52 = vstv %s2753_s12 }
  0xad   : > { %1311 = vmatpush1.msra.mxu1 %v2607_v34 }
  0xae   : > { %1604 = vmatprep.subr.mxu1 %v2591_v26  ;;  %v2012_v26 = vld [vmem:[%s2809_s3 + $0x8] sm:$0x7] }
  0xaf   : > { %1541 = vmatpush1.bf16.msra.mxu0 %v2179_v53  ;;  %v1693_v53 = vstv %s2015_s13 }
  0xb0   : > { %1954 = vmatmul.mubr.msk.f32.vlgmr.msra.gmra.mxu1 %vm906_vm0, %v1953_v55  ;;  %1542 = vmatprep.subr.bf16.mxu0 %v2184_v54 }
  0xb1   : > { %1605 = vmatpush1.msra.mxu1 %v2593_v27  ;;  %1642 = vmatprep.mubr.f32.mxu1 %v2291_v30  ;;  %v2188_v27 = vld [vmem:[%s2585_s14 + $0x1c0] ss:$8 sps:$4 sm:$0xff]   ;;  %v2191_v30 = vld [vmem:[%s2585_s14 + $0x290] ss:$8 sps:$4 sm:$0xff]  }
  0xb2   : > { %1606 = vmatprep.subr.mxu1 %v2597_v29  ;;  %v2193_v29 = vld [vmem:[%s2585_s14 + $0x294] ss:$8 sps:$4 sm:$0xff]  }
  0xb3   : > { %1543 = vmatpush1.bf16.msra.mxu0 %v2182_v56  ;;  %1607 = vmatpush1.msra.mxu1 %v2602_v32  ;;  %v2196_v32 = vld [vmem:[%s2585_s14 + $0x284] ss:$8 sps:$4 sm:$0xff]  }
  0xb4   : > { %1544 = vmatprep.subr.bf16.mxu0 %v2187_v57  ;;  %1608 = vmatprep.subr.mxu1 %v2604_v33  ;;  %v2194_v33 = vld [vmem:[%s2585_s14 + $0x280] ss:$8 sps:$4 sm:$0xff]  }
  0xb5   : > { %1609 = vmatpush1.msra.mxu1 %v2607_v34  ;;  %v2199_v34 = vld [vmem:[%s2585_s14 + $0x274] ss:$8 sps:$4 sm:$0xff]   ;;  %s2017_s14 = sld [smem:[#allocation4 + $0x3]] }
  0xb6   : > { %2013 = vmatmul.mubr.msk.f32.vlgmr.msra.gmra.mxu1 %vm906_vm0, %v2012_v26 }
  0xb7   : > { %1545 = vmatpush1.bf16.msra.mxu0 %v2185_v58 }
  0xb8   : > { %1546 = vmatprep.subr.bf16.mxu0 %v2190_v59 }
  0xbb   : > { %1547 = vmatpush1.bf16.msra.mxu0 %v2188_v27  ;;  %v1718_v55 = vstv %s2017_s14 }
  0xbc   : > { %1552 = vmatprep.subr.bf16.mxu0 %v2193_v29 }
  0xbf   : > { %1553 = vmatpush2.bf16.msra.mxu0 %v2191_v30 }
  0xc0   : > { %1554 = vmatprep.subr.bf16.mxu0 %v2196_v32 }
  0xc3   : > { %1555 = vmatpush2.bf16.msra.mxu0 %v2194_v33 }
  0xc4   : > { %1556 = vmatprep.subr.bf16.mxu0 %v2199_v34 }
  0xc7   : > { %1557 = vmatpush2.bf16.msra.mxu0 %v2197_v60 }
  0xc8   : > { %1558 = vmatprep.subr.bf16.mxu0 %v2202_v61 }
  0xcb   : > { %1559 = vmatpush2.bf16.msra.mxu0 %v2200_v62 }
  0xcc   : > { %1560 = vmatprep.subr.bf16.mxu0 %v2205_v63 }
  0xcf   : > { %1561 = vmatpush2.bf16.msra.mxu0 %v2203_v1 }
  0xd0   : > { %1562 = vmatprep.subr.bf16.mxu0 %v2208_v2 }
  0xd3   : > { %1563 = vmatpush2.bf16.msra.mxu0 %v2206_v3 }
  0xd6   : > { %1565 = vmatmul.mubr.bf16.vlgmr.msra.gmra.mxu0 %v2691_v40 }
 0x12a   : > { %v976_v4 = vpop.f32.mrf.mxu1 }
 0x12c   : > { %v978_v7 = vpop.f32.mrf.mxu1 }
 0x130   : > { %v1060_v9 = vpop.f32.mrf.mxu1 }
 0x132   : > { %v1062_v13 = vpop.f32.mrf.mxu1 }
 0x15e   : > { %v898_v5 = vpop.f32.mrf.mxu0 }
 0x15f   : > { %v984_v19 = vrot.slane %v898_v5, %v983_v18 }
 0x160   : > { %v900_v8 = vpop.f32.mrf.mxu0 }
 0x161   : > { %v988_v21 = vrot.slane %v900_v8, %v983_v18  ;;  %v989_v23 = vmul.f32 %v984_v19, %v976_v4 }
 0x162   : > { %v902_v10 = vpop.f32.mrf.mxu0 }
 0x163   : > { %v990_v28 = vmul.f32 %v988_v21, %v978_v7  ;;  %v1061_v37 = vadd.f32 %v1060_v9, %v989_v23 }
 0x164   : > { %v903_v12 = vpop.f32.mrf.mxu0 }
 0x165   : > { %v1063_v41 = vadd.f32 %v1062_v13, %v990_v28 }
 0x168   : > { %v1268_v14 = vpop.f32.mrf.mxu1 }
 0x169   : > { %v1354_v22 = vrot.slane %v1268_v14, %v983_v18 }
 0x16a   : > { %v1270_v15 = vpop.f32.mrf.mxu1 }
 0x16b   : > { %v1358_v24 = vrot.slane %v1270_v15, %v983_v18 }
 0x16c   : > { %v1272_v16 = vpop.f32.mrf.mxu1 }
 0x16e   : > { %v1273_v17 = vpop.f32.mrf.mxu1 }
 0x170   : > { %v1346_v20 = vpop.f32.mrf.mxu1 }
 0x171   : > { %v1359_v31 = vmul.f32 %v1354_v22, %v1346_v20 }
 0x172   : > { %v1348_v25 = vpop.f32.mrf.mxu1 }
 0x173   : > { %v1360_v6 = vmul.f32 %v1358_v24, %v1348_v25  ;;  %v1361_v40 = vadd.f32 %v1359_v31, %v1061_v37 }
 0x175   : > { %v1362_v47 = vadd.f32 %v1360_v6, %v1063_v41 }
 0x176   : > { %v1644_v36 = vpop.f32.mrf.mxu1 }
 0x178   : > { %v1646_v45 = vpop.f32.mrf.mxu1 }
 0x196   : > { %v1566_v35 = vpop.f32.mrf.mxu0 }
 0x197   : > { %v1652_v38 = vrot.slane %v1566_v35, %v983_v18 }
 0x198   : > { %v1568_v39 = vpop.f32.mrf.mxu0 }
 0x199   : > { %v1657_v42 = vmul.f32 %v1652_v38, %v1644_v36  ;;  %v1656_v43 = vrot.slane %v1568_v39, %v983_v18 }
 0x19a   : > { %v1570_v46 = vpop.f32.mrf.mxu0 }
 0x19b   : > { %v1659_v48 = vadd.f32 %v1657_v42, %v1361_v40  ;;  %v1658_v49 = vmul.f32 %v1656_v43, %v1646_v45 }
 0x19c   : > { %v1571_v50 = vpop.f32.mrf.mxu0 }
 0x19d   : > { %v1663_v51 = vmul.f32 %v1662_v44, %v1659_v48  ;;  %v1660_v54 = vadd.f32 %v1658_v49, %v1362_v47 }
 0x19f   : > { %v1664_v56 = vmul.f32 %v1662_v44, %v1660_v54  ;;  %v1667_v57 = vadd.f32 %v1666_v52, %v1663_v51  ;;  %v1694_v58 = vadd.f32 %v1693_v53, %v1663_v51  ;;  %v1719_v26 = vadd.f32 %v1718_v55, %v1663_v51 }
 0x1a1   : > { %v1668_v59 = vadd.f32 %v1666_v52, %v1664_v56  ;;  %v1695_v27 = vadd.f32 %v1693_v53, %v1664_v56  ;;  %v1720_v29 = vadd.f32 %v1718_v55, %v1664_v56 }
 0x1a3   : > { %v1671_v30 = vcombine.low %v1667_v57, %v1668_v59  ;;  %v1698_v32 = vcombine.low %v1694_v58, %v1695_v27  ;;  %v1723_v33 = vcombine.low %v1719_v26, %v1720_v29 }
 0x1a5   : > { %v1678_v34 = vrot.slane %v1671_v30, %v2664_v11  ;;  %v1705_v60 = vrot.slane %v1698_v32, %v2664_v11  ;;  %v1730_v61 = vrot.slane %v1723_v33, %v2664_v11 }
 0x1a7   : > { %v1706_v62 = vcombine.high %v1705_v60, %v1705_v60  ;;  %v1685_v63 = vrot.slane %v1678_v34, %v2664_v11  ;;  %v1737_v1 = vrot.slane %v1730_v61, %v2664_v11 }
 0x1a9   : > { %1691 = vst.msk [vmem:[%s654_s16] ss:$4 sm:$0x3] %vm1689_vm2, %v1685_v63  ;;  %v1713_v2 = vrot.slane %v1706_v62, %v2664_v11  ;;  %v1738_v3 = vcombine.high %v1737_v1, %v1737_v1 }
 0x1ab   : > { %2016 = vst.msk [vmem:[%s654_s16 + $0x1] ss:$4 sm:$0x3] %vm1689_vm2, %v1713_v2  ;;  %2018 = vst.msk [vmem:[%s654_s16 + $0x2] ss:$4 sm:$0x3] %vm1689_vm2, %v1738_v3 }
 0x1ac   : > { %2237 = shalt.err (!%p2234_p2)
}
 0x1ad   : > { %s2238_s11 = scalar_lea.hbm %s2769_s26, 128  ;;  %s2242_s13 = scalar_lea.hbm %s2811_s5, 256 }
 0x1ae   : > { %p2239_p3 = scmp.ne.s32.totalorder %s2769_s26, %s2238_s11  ;;  %p2243_p8 = scmp.lt.s32.totalorder %s2769_s26, %s2811_s5 }
 0x1af   : > { %p2244_p9 = scmp.lt.s32.totalorder %s2242_s13, %s2238_s11 }
 0x1b0   : > { %p2240_p4 = pnand %p2239_p3, %p2817_p10 }
 0x1b1   : > { %p2245_p5 = por %p2244_p9, %p2243_p8 }
 0x1b2   : > { %p2241_p7 = pneg %p2240_p4 }
 0x1b4   : > { %p2246_p11 = pnand %p2245_p5, %p2241_p7 }
 0x1b6   : > { %2249 = shalt.err (!%p2246_p11)
}
 0x1b7   : > { %2035 = dma.vmem_to_hbm [thread:$0]  (%p2817_p10), %s1758_s17, 128, %s2769_s26, %s1743_s22  }
 0x1b8 PF: > { %s1769_s6 = sand.u32 1, %s2276_s18   ;;  %p2818_p12 = scmp.ne.s32.totalorder %s2815_s30, 0 }
 0x1b9   : > { %s1770_s16 = scalar_lea.sflag [#allocation5], %s1769_s6 }
 0x1ba   : > { %p2042_p13 = pnand %p1855_p6, %p2818_p12 }
 0x1bc   : > { %p2043_p0 = pneg %p2042_p13 }
 0x1be   : > { %2271 = dma.done.wait (%p2043_p0), %s1770_s16, 128  }
 0x1bf   : > { %2273 = vsyncadd (%p2043_p0), %s1770_s16, 4294967168  ;;  %p16_p1 = scmp.ge.s32.totalorder %s2349_s24, 4   ;;  %s2819_s18 = smov %s2280_s19 }
 0x1c0   : > { %s2820_s19 = smov %s2284_s20  ;;  %s2821_s20 = smov %s2361_s27 }
 0x1c1   : > { %s2822_s21 = smov %s2349_s24  ;;  %18 = sbr.rel (!%p16_p1) target bundleno = 4 (0x4), region = 161 }
 0x1c6   :  { %1775 = vsyncpa [#allocation5], 1 }
 0x1c7   :  { %1777 = vsyncpa [#allocation5 + $0x1], 1 }
 0x1c8   :  { %1778 = vsyncpa [#allocation6], 1 }
 0x1c9   :  { %1780 = vsyncpa [#allocation6 + $0x1], 1 }

</bundles_post_ra>
